<compile_context>
chip_gen: v7x
topology: tpu7x:2x2x1
jax: 0.10.0
libtpu: 0.0.40
codegen_flags: <defaults>
</compile_context>

<pallas_src>
import jax
import jax.numpy as jnp
from jax import lax
from jax.experimental import pallas as pl
from jax.experimental.pallas import tpu as pltpu


def subnet_mt_kernel(x_ref, wih_ref, whh_ref, b_ref, wout_ref, bout_ref, y_ref):
    """Full LSTM recurrence + final Linear + ReLU in one kernel.

    x_ref   : (B, T, in_size)      batch-first input
    wih_ref : (in_size, 4*H)       W_ih transposed
    whh_ref : (H, 4*H)             W_hh transposed
    b_ref   : (1, 4*H)             b_ih + b_hh
    wout_ref: (H, out_size)        linear_1 weight transposed
    bout_ref: (1, out_size)        linear_1 bias
    y_ref   : (B, out_size)        output = relu(h_T @ Wout + bout)
    """
    B, T, IN = x_ref.shape
    H = whh_ref.shape[0]

    # ---- input projection hoisted out of the recurrence (single MXU call) ----
    x_flat = x_ref[...].reshape(B * T, IN)
    gx = jnp.dot(x_flat, wih_ref[...], preferred_element_type=jnp.float32)
    gx = gx + b_ref[...]                      # bias folded in once, not per step
    gx = gx.reshape(B, T, 4 * H)              # natural (8,128)-tiled layout

    # Lane mask for the 'g' gate ([2H, 3H)): lets a single sigmoid pass cover
    # i/f/o (sigmoid) and g (tanh via tanh(x) = 2*sigmoid(2x) - 1).
    col = lax.broadcasted_iota(jnp.int32, (B, 4 * H), 1)
    g_mask = jnp.logical_and(col >= 2 * H, col < 3 * H)

    whh = whh_ref[...]
    h = jnp.zeros((B, H), jnp.float32)
    c = jnp.zeros((B, H), jnp.float32)

    # T is static and small: full unroll with register-carried h/c keeps only
    # the h @ W_hh matmul + elementwise combine on the serial critical path.
    for t in range(T):
        gates = gx[:, t, :] + jnp.dot(h, whh, preferred_element_type=jnp.float32)
        pre = jnp.where(g_mask, gates * 2.0, gates)
        s = jax.nn.sigmoid(pre)
        act = jnp.where(g_mask, 2.0 * s - 1.0, s)   # sigmoid(i,f,o), tanh(g)
        i = act[:, 0 * H:1 * H]
        f = act[:, 1 * H:2 * H]
        g = act[:, 2 * H:3 * H]
        o = act[:, 3 * H:4 * H]
        c = f * c + i * g
        h = o * jnp.tanh(c)

    # dropout(p=0) is identity; final Linear + ReLU on the last hidden state.
    y = jnp.dot(h, wout_ref[...], preferred_element_type=jnp.float32) + bout_ref[...]
    y_ref[...] = jnp.maximum(y, 0.0).astype(y_ref.dtype)


def subnet_mt_forward(x, params):
    """x: (B, T, in_size) batch-first, like the PyTorch module."""
    B, T, in_size = x.shape
    out_size = params["w_out_t"].shape[1]

    vmem = pl.BlockSpec(memory_space=pltpu.MemorySpace.VMEM)
    return pl.pallas_call(
        subnet_mt_kernel,
        out_shape=jax.ShapeDtypeStruct((B, out_size), jnp.float32),
        in_specs=[vmem] * 6,
        out_specs=vmem,
    )(x,
      params["w_ih_t"], params["w_hh_t"], params["b_gates"],
      params["w_out_t"], params["b_out"])


def init_params(key, in_size, hidden_size, out_size):
    """Deterministic init mimicking PyTorch's U(-1/sqrt(H), 1/sqrt(H))."""
    k = jax.random.split(key, 6)
    s = 1.0 / jnp.sqrt(hidden_size)
    w_ih = jax.random.uniform(k[0], (4 * hidden_size, in_size), jnp.float32, -s, s)
    w_hh = jax.random.uniform(k[1], (4 * hidden_size, hidden_size), jnp.float32, -s, s)
    b_ih = jax.random.uniform(k[2], (4 * hidden_size,), jnp.float32, -s, s)
    b_hh = jax.random.uniform(k[3], (4 * hidden_size,), jnp.float32, -s, s)
    so = 1.0 / jnp.sqrt(hidden_size)
    w_out = jax.random.uniform(k[4], (out_size, hidden_size), jnp.float32, -so, so)
    b_out = jax.random.uniform(k[5], (out_size,), jnp.float32, -so, so)
    return {
        "w_ih_t": w_ih.T,                              # (in, 4H)
        "w_hh_t": w_hh.T,                              # (H, 4H)
        "b_gates": (b_ih + b_hh).reshape(1, -1),       # (1, 4H)
        "w_out_t": w_out.T,                            # (H, out)
        "b_out": b_out.reshape(1, -1),                 # (1, out)
    }


def reference_forward(x, params):
    """Pure-JAX reference of the same math (for sanity check)."""
    B, T, _ = x.shape
    H = params["w_hh_t"].shape[0]
    h = jnp.zeros((B, H), jnp.float32)
    c = jnp.zeros((B, H), jnp.float32)
    for t in range(T):
        gates = x[:, t, :] @ params["w_ih_t"] + h @ params["w_hh_t"] + params["b_gates"]
        i = jax.nn.sigmoid(gates[:, 0 * H:1 * H])
        f = jax.nn.sigmoid(gates[:, 1 * H:2 * H])
        g = jnp.tanh(gates[:, 2 * H:3 * H])
        o = jax.nn.sigmoid(gates[:, 3 * H:4 * H])
        c = f * c + i * g
        h = o * jnp.tanh(c)
    return jnp.maximum(h @ params["w_out_t"] + params["b_out"], 0.0)


if __name__ == "__main__":
    B, T, IN, HID, OUT = 2, 8, 16, 32, 32

    key = jax.random.PRNGKey(0)
    kx, kp = jax.random.split(key)
    x = jax.random.normal(kx, (B, T, IN), dtype=jnp.float32)
    params = init_params(kp, IN, HID, OUT)

    y = subnet_mt_forward(x, params)
    y = jax.block_until_ready(y)

    y_ref = reference_forward(x, params)
    assert y.shape == (B, OUT)
    assert jnp.allclose(y, y_ref, atol=1e-3, rtol=1e-3)

    print("KERNEL_OK")
</pallas_src>

<mosaic_0001>
module attributes {stable_mosaic.version = 11 : i64} {
  func.func @subnet_mt_kernel(%arg0: memref<2x8x16xf32, #tpu.memory_space<vmem>>, %arg1: memref<16x128xf32, #tpu.memory_space<vmem>>, %arg2: memref<32x128xf32, #tpu.memory_space<vmem>>, %arg3: memref<1x128xf32, #tpu.memory_space<vmem>>, %arg4: memref<32x32xf32, #tpu.memory_space<vmem>>, %arg5: memref<1x32xf32, #tpu.memory_space<vmem>>, %arg6: memref<2x32xf32, #tpu.memory_space<vmem>>) attributes {dimension_semantics = [], scalar_prefetch = 0 : i64, scratch_operands = 0 : i64, tpu.core_type = #tpu.core_type<tc>} {
    %c0 = arith.constant 0 : index
    %c0_0 = arith.constant 0 : index
    %c0_1 = arith.constant 0 : index
    %0 = vector.load %arg0[%c0, %c0_0, %c0_1] : memref<2x8x16xf32, #tpu.memory_space<vmem>>, vector<2x8x16xf32>
    %1 = vector.shape_cast %0 : vector<2x8x16xf32> to vector<16x16xf32>
    %c0_2 = arith.constant 0 : index
    %c0_3 = arith.constant 0 : index
    %2 = vector.load %arg1[%c0_2, %c0_3] : memref<16x128xf32, #tpu.memory_space<vmem>>, vector<16x128xf32>
    %cst = arith.constant dense<0.000000e+00> : vector<16x128xf32>
    %3 = tpu.matmul %1, %2, %cst {dimension_numbers = #tpu.dot_dimension_numbers<[1], [0], [0], [1], [0, 0, 1, 1], [], []>} : vector<16x16xf32>, vector<16x128xf32>, vector<16x128xf32> -> vector<16x128xf32>
    %c0_4 = arith.constant 0 : index
    %c0_5 = arith.constant 0 : index
    %4 = vector.load %arg3[%c0_4, %c0_5] : memref<1x128xf32, #tpu.memory_space<vmem>>, vector<1x128xf32>
    %5 = vector.broadcast %4 : vector<1x128xf32> to vector<16x128xf32>
    %6 = arith.addf %3, %5 : vector<16x128xf32>
    %7 = vector.shape_cast %6 : vector<16x128xf32> to vector<2x8x128xf32>
    %8 = tpu.iota {dimensions = array<i32: 1>} : vector<2x128xi32>
    %c64_i32 = arith.constant 64 : i32
    %9 = vector.broadcast %c64_i32 : i32 to vector<2x128xi32>
    %10 = arith.cmpi sge, %8, %9 : vector<2x128xi32>
    %c96_i32 = arith.constant 96 : i32
    %11 = vector.broadcast %c96_i32 : i32 to vector<2x128xi32>
    %12 = arith.cmpi slt, %8, %11 : vector<2x128xi32>
    %13 = arith.andi %10, %12 : vector<2x128xi1>
    %c0_6 = arith.constant 0 : index
    %c0_7 = arith.constant 0 : index
    %14 = vector.load %arg2[%c0_6, %c0_7] : memref<32x128xf32, #tpu.memory_space<vmem>>, vector<32x128xf32>
    %cst_8 = arith.constant 0.000000e+00 : f32
    %15 = vector.broadcast %cst_8 : f32 to vector<2x32xf32>
    %cst_9 = arith.constant 0.000000e+00 : f32
    %16 = vector.broadcast %cst_9 : f32 to vector<2x32xf32>
    %17 = vector.extract_strided_slice %7 {offsets = [0, 0, 0], sizes = [2, 1, 128], strides = [1, 1, 1]} : vector<2x8x128xf32> to vector<2x1x128xf32>
    %18 = vector.shape_cast %17 : vector<2x1x128xf32> to vector<2x128xf32>
    %cst_10 = arith.constant dense<0.000000e+00> : vector<2x128xf32>
    %19 = tpu.matmul %15, %14, %cst_10 {dimension_numbers = #tpu.dot_dimension_numbers<[1], [0], [0], [1], [0, 0, 1, 1], [], []>} : vector<2x32xf32>, vector<32x128xf32>, vector<2x128xf32> -> vector<2x128xf32>
    %20 = arith.addf %18, %19 : vector<2x128xf32>
    %cst_11 = arith.constant 2.000000e+00 : f32
    %21 = vector.broadcast %cst_11 : f32 to vector<2x128xf32>
    %22 = arith.mulf %20, %21 : vector<2x128xf32>
    %23 = arith.select %13, %22, %20 : vector<2x128xi1>, vector<2x128xf32>
    %24 = arith.negf %23 : vector<2x128xf32>
    %25 = math.exp %24 : vector<2x128xf32>
    %cst_12 = arith.constant 1.000000e+00 : f32
    %26 = vector.broadcast %cst_12 : f32 to vector<2x128xf32>
    %27 = arith.addf %26, %25 : vector<2x128xf32>
    %28 = arith.divf %26, %27 : vector<2x128xf32>
    %cst_13 = arith.constant 2.000000e+00 : f32
    %29 = vector.broadcast %cst_13 : f32 to vector<2x128xf32>
    %30 = arith.mulf %29, %28 : vector<2x128xf32>
    %cst_14 = arith.constant 1.000000e+00 : f32
    %31 = vector.broadcast %cst_14 : f32 to vector<2x128xf32>
    %32 = arith.subf %30, %31 : vector<2x128xf32>
    %33 = arith.select %13, %32, %28 : vector<2x128xi1>, vector<2x128xf32>
    %34 = vector.extract_strided_slice %33 {offsets = [0, 0], sizes = [2, 32], strides = [1, 1]} : vector<2x128xf32> to vector<2x32xf32>
    %35 = vector.extract_strided_slice %33 {offsets = [0, 32], sizes = [2, 32], strides = [1, 1]} : vector<2x128xf32> to vector<2x32xf32>
    %36 = vector.extract_strided_slice %33 {offsets = [0, 64], sizes = [2, 32], strides = [1, 1]} : vector<2x128xf32> to vector<2x32xf32>
    %37 = vector.extract_strided_slice %33 {offsets = [0, 96], sizes = [2, 32], strides = [1, 1]} : vector<2x128xf32> to vector<2x32xf32>
    %38 = arith.mulf %35, %16 : vector<2x32xf32>
    %39 = arith.mulf %34, %36 : vector<2x32xf32>
    %40 = arith.addf %38, %39 : vector<2x32xf32>
    %41 = math.tanh %40 : vector<2x32xf32>
    %42 = arith.mulf %37, %41 : vector<2x32xf32>
    %43 = vector.extract_strided_slice %7 {offsets = [0, 1, 0], sizes = [2, 1, 128], strides = [1, 1, 1]} : vector<2x8x128xf32> to vector<2x1x128xf32>
    %44 = vector.shape_cast %43 : vector<2x1x128xf32> to vector<2x128xf32>
    %cst_15 = arith.constant dense<0.000000e+00> : vector<2x128xf32>
    %45 = tpu.matmul %42, %14, %cst_15 {dimension_numbers = #tpu.dot_dimension_numbers<[1], [0], [0], [1], [0, 0, 1, 1], [], []>} : vector<2x32xf32>, vector<32x128xf32>, vector<2x128xf32> -> vector<2x128xf32>
    %46 = arith.addf %44, %45 : vector<2x128xf32>
    %cst_16 = arith.constant 2.000000e+00 : f32
    %47 = vector.broadcast %cst_16 : f32 to vector<2x128xf32>
    %48 = arith.mulf %46, %47 : vector<2x128xf32>
    %49 = arith.select %13, %48, %46 : vector<2x128xi1>, vector<2x128xf32>
    %50 = arith.negf %49 : vector<2x128xf32>
    %51 = math.exp %50 : vector<2x128xf32>
    %cst_17 = arith.constant 1.000000e+00 : f32
    %52 = vector.broadcast %cst_17 : f32 to vector<2x128xf32>
    %53 = arith.addf %52, %51 : vector<2x128xf32>
    %54 = arith.divf %52, %53 : vector<2x128xf32>
    %cst_18 = arith.constant 2.000000e+00 : f32
    %55 = vector.broadcast %cst_18 : f32 to vector<2x128xf32>
    %56 = arith.mulf %55, %54 : vector<2x128xf32>
    %cst_19 = arith.constant 1.000000e+00 : f32
    %57 = vector.broadcast %cst_19 : f32 to vector<2x128xf32>
    %58 = arith.subf %56, %57 : vector<2x128xf32>
    %59 = arith.select %13, %58, %54 : vector<2x128xi1>, vector<2x128xf32>
    %60 = vector.extract_strided_slice %59 {offsets = [0, 0], sizes = [2, 32], strides = [1, 1]} : vector<2x128xf32> to vector<2x32xf32>
    %61 = vector.extract_strided_slice %59 {offsets = [0, 32], sizes = [2, 32], strides = [1, 1]} : vector<2x128xf32> to vector<2x32xf32>
    %62 = vector.extract_strided_slice %59 {offsets = [0, 64], sizes = [2, 32], strides = [1, 1]} : vector<2x128xf32> to vector<2x32xf32>
    %63 = vector.extract_strided_slice %59 {offsets = [0, 96], sizes = [2, 32], strides = [1, 1]} : vector<2x128xf32> to vector<2x32xf32>
    %64 = arith.mulf %61, %40 : vector<2x32xf32>
    %65 = arith.mulf %60, %62 : vector<2x32xf32>
    %66 = arith.addf %64, %65 : vector<2x32xf32>
    %67 = math.tanh %66 : vector<2x32xf32>
    %68 = arith.mulf %63, %67 : vector<2x32xf32>
    %69 = vector.extract_strided_slice %7 {offsets = [0, 2, 0], sizes = [2, 1, 128], strides = [1, 1, 1]} : vector<2x8x128xf32> to vector<2x1x128xf32>
    %70 = vector.shape_cast %69 : vector<2x1x128xf32> to vector<2x128xf32>
    %cst_20 = arith.constant dense<0.000000e+00> : vector<2x128xf32>
    %71 = tpu.matmul %68, %14, %cst_20 {dimension_numbers = #tpu.dot_dimension_numbers<[1], [0], [0], [1], [0, 0, 1, 1], [], []>} : vector<2x32xf32>, vector<32x128xf32>, vector<2x128xf32> -> vector<2x128xf32>
    %72 = arith.addf %70, %71 : vector<2x128xf32>
    %cst_21 = arith.constant 2.000000e+00 : f32
    %73 = vector.broadcast %cst_21 : f32 to vector<2x128xf32>
    %74 = arith.mulf %72, %73 : vector<2x128xf32>
    %75 = arith.select %13, %74, %72 : vector<2x128xi1>, vector<2x128xf32>
    %76 = arith.negf %75 : vector<2x128xf32>
    %77 = math.exp %76 : vector<2x128xf32>
    %cst_22 = arith.constant 1.000000e+00 : f32
    %78 = vector.broadcast %cst_22 : f32 to vector<2x128xf32>
    %79 = arith.addf %78, %77 : vector<2x128xf32>
    %80 = arith.divf %78, %79 : vector<2x128xf32>
    %cst_23 = arith.constant 2.000000e+00 : f32
    %81 = vector.broadcast %cst_23 : f32 to vector<2x128xf32>
    %82 = arith.mulf %81, %80 : vector<2x128xf32>
    %cst_24 = arith.constant 1.000000e+00 : f32
    %83 = vector.broadcast %cst_24 : f32 to vector<2x128xf32>
    %84 = arith.subf %82, %83 : vector<2x128xf32>
    %85 = arith.select %13, %84, %80 : vector<2x128xi1>, vector<2x128xf32>
    %86 = vector.extract_strided_slice %85 {offsets = [0, 0], sizes = [2, 32], strides = [1, 1]} : vector<2x128xf32> to vector<2x32xf32>
    %87 = vector.extract_strided_slice %85 {offsets = [0, 32], sizes = [2, 32], strides = [1, 1]} : vector<2x128xf32> to vector<2x32xf32>
    %88 = vector.extract_strided_slice %85 {offsets = [0, 64], sizes = [2, 32], strides = [1, 1]} : vector<2x128xf32> to vector<2x32xf32>
    %89 = vector.extract_strided_slice %85 {offsets = [0, 96], sizes = [2, 32], strides = [1, 1]} : vector<2x128xf32> to vector<2x32xf32>
    %90 = arith.mulf %87, %66 : vector<2x32xf32>
    %91 = arith.mulf %86, %88 : vector<2x32xf32>
    %92 = arith.addf %90, %91 : vector<2x32xf32>
    %93 = math.tanh %92 : vector<2x32xf32>
    %94 = arith.mulf %89, %93 : vector<2x32xf32>
    %95 = vector.extract_strided_slice %7 {offsets = [0, 3, 0], sizes = [2, 1, 128], strides = [1, 1, 1]} : vector<2x8x128xf32> to vector<2x1x128xf32>
    %96 = vector.shape_cast %95 : vector<2x1x128xf32> to vector<2x128xf32>
    %cst_25 = arith.constant dense<0.000000e+00> : vector<2x128xf32>
    %97 = tpu.matmul %94, %14, %cst_25 {dimension_numbers = #tpu.dot_dimension_numbers<[1], [0], [0], [1], [0, 0, 1, 1], [], []>} : vector<2x32xf32>, vector<32x128xf32>, vector<2x128xf32> -> vector<2x128xf32>
    %98 = arith.addf %96, %97 : vector<2x128xf32>
    %cst_26 = arith.constant 2.000000e+00 : f32
    %99 = vector.broadcast %cst_26 : f32 to vector<2x128xf32>
    %100 = arith.mulf %98, %99 : vector<2x128xf32>
    %101 = arith.select %13, %100, %98 : vector<2x128xi1>, vector<2x128xf32>
    %102 = arith.negf %101 : vector<2x128xf32>
    %103 = math.exp %102 : vector<2x128xf32>
    %cst_27 = arith.constant 1.000000e+00 : f32
    %104 = vector.broadcast %cst_27 : f32 to vector<2x128xf32>
    %105 = arith.addf %104, %103 : vector<2x128xf32>
    %106 = arith.divf %104, %105 : vector<2x128xf32>
    %cst_28 = arith.constant 2.000000e+00 : f32
    %107 = vector.broadcast %cst_28 : f32 to vector<2x128xf32>
    %108 = arith.mulf %107, %106 : vector<2x128xf32>
    %cst_29 = arith.constant 1.000000e+00 : f32
    %109 = vector.broadcast %cst_29 : f32 to vector<2x128xf32>
    %110 = arith.subf %108, %109 : vector<2x128xf32>
    %111 = arith.select %13, %110, %106 : vector<2x128xi1>, vector<2x128xf32>
    %112 = vector.extract_strided_slice %111 {offsets = [0, 0], sizes = [2, 32], strides = [1, 1]} : vector<2x128xf32> to vector<2x32xf32>
    %113 = vector.extract_strided_slice %111 {offsets = [0, 32], sizes = [2, 32], strides = [1, 1]} : vector<2x128xf32> to vector<2x32xf32>
    %114 = vector.extract_strided_slice %111 {offsets = [0, 64], sizes = [2, 32], strides = [1, 1]} : vector<2x128xf32> to vector<2x32xf32>
    %115 = vector.extract_strided_slice %111 {offsets = [0, 96], sizes = [2, 32], strides = [1, 1]} : vector<2x128xf32> to vector<2x32xf32>
    %116 = arith.mulf %113, %92 : vector<2x32xf32>
    %117 = arith.mulf %112, %114 : vector<2x32xf32>
    %118 = arith.addf %116, %117 : vector<2x32xf32>
    %119 = math.tanh %118 : vector<2x32xf32>
    %120 = arith.mulf %115, %119 : vector<2x32xf32>
    %121 = vector.extract_strided_slice %7 {offsets = [0, 4, 0], sizes = [2, 1, 128], strides = [1, 1, 1]} : vector<2x8x128xf32> to vector<2x1x128xf32>
    %122 = vector.shape_cast %121 : vector<2x1x128xf32> to vector<2x128xf32>
    %cst_30 = arith.constant dense<0.000000e+00> : vector<2x128xf32>
    %123 = tpu.matmul %120, %14, %cst_30 {dimension_numbers = #tpu.dot_dimension_numbers<[1], [0], [0], [1], [0, 0, 1, 1], [], []>} : vector<2x32xf32>, vector<32x128xf32>, vector<2x128xf32> -> vector<2x128xf32>
    %124 = arith.addf %122, %123 : vector<2x128xf32>
    %cst_31 = arith.constant 2.000000e+00 : f32
    %125 = vector.broadcast %cst_31 : f32 to vector<2x128xf32>
    %126 = arith.mulf %124, %125 : vector<2x128xf32>
    %127 = arith.select %13, %126, %124 : vector<2x128xi1>, vector<2x128xf32>
    %128 = arith.negf %127 : vector<2x128xf32>
    %129 = math.exp %128 : vector<2x128xf32>
    %cst_32 = arith.constant 1.000000e+00 : f32
    %130 = vector.broadcast %cst_32 : f32 to vector<2x128xf32>
    %131 = arith.addf %130, %129 : vector<2x128xf32>
    %132 = arith.divf %130, %131 : vector<2x128xf32>
    %cst_33 = arith.constant 2.000000e+00 : f32
    %133 = vector.broadcast %cst_33 : f32 to vector<2x128xf32>
    %134 = arith.mulf %133, %132 : vector<2x128xf32>
    %cst_34 = arith.constant 1.000000e+00 : f32
    %135 = vector.broadcast %cst_34 : f32 to vector<2x128xf32>
    %136 = arith.subf %134, %135 : vector<2x128xf32>
    %137 = arith.select %13, %136, %132 : vector<2x128xi1>, vector<2x128xf32>
    %138 = vector.extract_strided_slice %137 {offsets = [0, 0], sizes = [2, 32], strides = [1, 1]} : vector<2x128xf32> to vector<2x32xf32>
    %139 = vector.extract_strided_slice %137 {offsets = [0, 32], sizes = [2, 32], strides = [1, 1]} : vector<2x128xf32> to vector<2x32xf32>
    %140 = vector.extract_strided_slice %137 {offsets = [0, 64], sizes = [2, 32], strides = [1, 1]} : vector<2x128xf32> to vector<2x32xf32>
    %141 = vector.extract_strided_slice %137 {offsets = [0, 96], sizes = [2, 32], strides = [1, 1]} : vector<2x128xf32> to vector<2x32xf32>
    %142 = arith.mulf %139, %118 : vector<2x32xf32>
    %143 = arith.mulf %138, %140 : vector<2x32xf32>
    %144 = arith.addf %142, %143 : vector<2x32xf32>
    %145 = math.tanh %144 : vector<2x32xf32>
    %146 = arith.mulf %141, %145 : vector<2x32xf32>
    %147 = vector.extract_strided_slice %7 {offsets = [0, 5, 0], sizes = [2, 1, 128], strides = [1, 1, 1]} : vector<2x8x128xf32> to vector<2x1x128xf32>
    %148 = vector.shape_cast %147 : vector<2x1x128xf32> to vector<2x128xf32>
    %cst_35 = arith.constant dense<0.000000e+00> : vector<2x128xf32>
    %149 = tpu.matmul %146, %14, %cst_35 {dimension_numbers = #tpu.dot_dimension_numbers<[1], [0], [0], [1], [0, 0, 1, 1], [], []>} : vector<2x32xf32>, vector<32x128xf32>, vector<2x128xf32> -> vector<2x128xf32>
    %150 = arith.addf %148, %149 : vector<2x128xf32>
    %cst_36 = arith.constant 2.000000e+00 : f32
    %151 = vector.broadcast %cst_36 : f32 to vector<2x128xf32>
    %152 = arith.mulf %150, %151 : vector<2x128xf32>
    %153 = arith.select %13, %152, %150 : vector<2x128xi1>, vector<2x128xf32>
    %154 = arith.negf %153 : vector<2x128xf32>
    %155 = math.exp %154 : vector<2x128xf32>
    %cst_37 = arith.constant 1.000000e+00 : f32
    %156 = vector.broadcast %cst_37 : f32 to vector<2x128xf32>
    %157 = arith.addf %156, %155 : vector<2x128xf32>
    %158 = arith.divf %156, %157 : vector<2x128xf32>
    %cst_38 = arith.constant 2.000000e+00 : f32
    %159 = vector.broadcast %cst_38 : f32 to vector<2x128xf32>
    %160 = arith.mulf %159, %158 : vector<2x128xf32>
    %cst_39 = arith.constant 1.000000e+00 : f32
    %161 = vector.broadcast %cst_39 : f32 to vector<2x128xf32>
    %162 = arith.subf %160, %161 : vector<2x128xf32>
    %163 = arith.select %13, %162, %158 : vector<2x128xi1>, vector<2x128xf32>
    %164 = vector.extract_strided_slice %163 {offsets = [0, 0], sizes = [2, 32], strides = [1, 1]} : vector<2x128xf32> to vector<2x32xf32>
    %165 = vector.extract_strided_slice %163 {offsets = [0, 32], sizes = [2, 32], strides = [1, 1]} : vector<2x128xf32> to vector<2x32xf32>
    %166 = vector.extract_strided_slice %163 {offsets = [0, 64], sizes = [2, 32], strides = [1, 1]} : vector<2x128xf32> to vector<2x32xf32>
    %167 = vector.extract_strided_slice %163 {offsets = [0, 96], sizes = [2, 32], strides = [1, 1]} : vector<2x128xf32> to vector<2x32xf32>
    %168 = arith.mulf %165, %144 : vector<2x32xf32>
    %169 = arith.mulf %164, %166 : vector<2x32xf32>
    %170 = arith.addf %168, %169 : vector<2x32xf32>
    %171 = math.tanh %170 : vector<2x32xf32>
    %172 = arith.mulf %167, %171 : vector<2x32xf32>
    %173 = vector.extract_strided_slice %7 {offsets = [0, 6, 0], sizes = [2, 1, 128], strides = [1, 1, 1]} : vector<2x8x128xf32> to vector<2x1x128xf32>
    %174 = vector.shape_cast %173 : vector<2x1x128xf32> to vector<2x128xf32>
    %cst_40 = arith.constant dense<0.000000e+00> : vector<2x128xf32>
    %175 = tpu.matmul %172, %14, %cst_40 {dimension_numbers = #tpu.dot_dimension_numbers<[1], [0], [0], [1], [0, 0, 1, 1], [], []>} : vector<2x32xf32>, vector<32x128xf32>, vector<2x128xf32> -> vector<2x128xf32>
    %176 = arith.addf %174, %175 : vector<2x128xf32>
    %cst_41 = arith.constant 2.000000e+00 : f32
    %177 = vector.broadcast %cst_41 : f32 to vector<2x128xf32>
    %178 = arith.mulf %176, %177 : vector<2x128xf32>
    %179 = arith.select %13, %178, %176 : vector<2x128xi1>, vector<2x128xf32>
    %180 = arith.negf %179 : vector<2x128xf32>
    %181 = math.exp %180 : vector<2x128xf32>
    %cst_42 = arith.constant 1.000000e+00 : f32
    %182 = vector.broadcast %cst_42 : f32 to vector<2x128xf32>
    %183 = arith.addf %182, %181 : vector<2x128xf32>
    %184 = arith.divf %182, %183 : vector<2x128xf32>
    %cst_43 = arith.constant 2.000000e+00 : f32
    %185 = vector.broadcast %cst_43 : f32 to vector<2x128xf32>
    %186 = arith.mulf %185, %184 : vector<2x128xf32>
    %cst_44 = arith.constant 1.000000e+00 : f32
    %187 = vector.broadcast %cst_44 : f32 to vector<2x128xf32>
    %188 = arith.subf %186, %187 : vector<2x128xf32>
    %189 = arith.select %13, %188, %184 : vector<2x128xi1>, vector<2x128xf32>
    %190 = vector.extract_strided_slice %189 {offsets = [0, 0], sizes = [2, 32], strides = [1, 1]} : vector<2x128xf32> to vector<2x32xf32>
    %191 = vector.extract_strided_slice %189 {offsets = [0, 32], sizes = [2, 32], strides = [1, 1]} : vector<2x128xf32> to vector<2x32xf32>
    %192 = vector.extract_strided_slice %189 {offsets = [0, 64], sizes = [2, 32], strides = [1, 1]} : vector<2x128xf32> to vector<2x32xf32>
    %193 = vector.extract_strided_slice %189 {offsets = [0, 96], sizes = [2, 32], strides = [1, 1]} : vector<2x128xf32> to vector<2x32xf32>
    %194 = arith.mulf %191, %170 : vector<2x32xf32>
    %195 = arith.mulf %190, %192 : vector<2x32xf32>
    %196 = arith.addf %194, %195 : vector<2x32xf32>
    %197 = math.tanh %196 : vector<2x32xf32>
    %198 = arith.mulf %193, %197 : vector<2x32xf32>
    %199 = vector.extract_strided_slice %7 {offsets = [0, 7, 0], sizes = [2, 1, 128], strides = [1, 1, 1]} : vector<2x8x128xf32> to vector<2x1x128xf32>
    %200 = vector.shape_cast %199 : vector<2x1x128xf32> to vector<2x128xf32>
    %cst_45 = arith.constant dense<0.000000e+00> : vector<2x128xf32>
    %201 = tpu.matmul %198, %14, %cst_45 {dimension_numbers = #tpu.dot_dimension_numbers<[1], [0], [0], [1], [0, 0, 1, 1], [], []>} : vector<2x32xf32>, vector<32x128xf32>, vector<2x128xf32> -> vector<2x128xf32>
    %202 = arith.addf %200, %201 : vector<2x128xf32>
    %cst_46 = arith.constant 2.000000e+00 : f32
    %203 = vector.broadcast %cst_46 : f32 to vector<2x128xf32>
    %204 = arith.mulf %202, %203 : vector<2x128xf32>
    %205 = arith.select %13, %204, %202 : vector<2x128xi1>, vector<2x128xf32>
    %206 = arith.negf %205 : vector<2x128xf32>
    %207 = math.exp %206 : vector<2x128xf32>
    %cst_47 = arith.constant 1.000000e+00 : f32
    %208 = vector.broadcast %cst_47 : f32 to vector<2x128xf32>
    %209 = arith.addf %208, %207 : vector<2x128xf32>
    %210 = arith.divf %208, %209 : vector<2x128xf32>
    %cst_48 = arith.constant 2.000000e+00 : f32
    %211 = vector.broadcast %cst_48 : f32 to vector<2x128xf32>
    %212 = arith.mulf %211, %210 : vector<2x128xf32>
    %cst_49 = arith.constant 1.000000e+00 : f32
    %213 = vector.broadcast %cst_49 : f32 to vector<2x128xf32>
    %214 = arith.subf %212, %213 : vector<2x128xf32>
    %215 = arith.select %13, %214, %210 : vector<2x128xi1>, vector<2x128xf32>
    %216 = vector.extract_strided_slice %215 {offsets = [0, 0], sizes = [2, 32], strides = [1, 1]} : vector<2x128xf32> to vector<2x32xf32>
    %217 = vector.extract_strided_slice %215 {offsets = [0, 32], sizes = [2, 32], strides = [1, 1]} : vector<2x128xf32> to vector<2x32xf32>
    %218 = vector.extract_strided_slice %215 {offsets = [0, 64], sizes = [2, 32], strides = [1, 1]} : vector<2x128xf32> to vector<2x32xf32>
    %219 = vector.extract_strided_slice %215 {offsets = [0, 96], sizes = [2, 32], strides = [1, 1]} : vector<2x128xf32> to vector<2x32xf32>
    %220 = arith.mulf %217, %196 : vector<2x32xf32>
    %221 = arith.mulf %216, %218 : vector<2x32xf32>
    %222 = arith.addf %220, %221 : vector<2x32xf32>
    %223 = math.tanh %222 : vector<2x32xf32>
    %224 = arith.mulf %219, %223 : vector<2x32xf32>
    %c0_50 = arith.constant 0 : index
    %c0_51 = arith.constant 0 : index
    %225 = vector.load %arg4[%c0_50, %c0_51] : memref<32x32xf32, #tpu.memory_space<vmem>>, vector<32x32xf32>
    %cst_52 = arith.constant dense<0.000000e+00> : vector<2x32xf32>
    %226 = tpu.matmul %224, %225, %cst_52 {dimension_numbers = #tpu.dot_dimension_numbers<[1], [0], [0], [1], [0, 0, 1, 1], [], []>} : vector<2x32xf32>, vector<32x32xf32>, vector<2x32xf32> -> vector<2x32xf32>
    %c0_53 = arith.constant 0 : index
    %c0_54 = arith.constant 0 : index
    %227 = vector.load %arg5[%c0_53, %c0_54] : memref<1x32xf32, #tpu.memory_space<vmem>>, vector<1x32xf32>
    %228 = vector.broadcast %227 : vector<1x32xf32> to vector<2x32xf32>
    %229 = arith.addf %226, %228 : vector<2x32xf32>
    %cst_55 = arith.constant 0.000000e+00 : f32
    %230 = vector.broadcast %cst_55 : f32 to vector<2x32xf32>
    %231 = arith.maximumf %229, %230 : vector<2x32xf32>
    %c0_56 = arith.constant 0 : index
    %c0_57 = arith.constant 0 : index
    %232 = vector.load %arg6[%c0_56, %c0_57] : memref<2x32xf32, #tpu.memory_space<vmem>>, vector<2x32xf32>
    tpu.vector_store %arg6[%c0_56, %c0_57], %231 {strides = array<i32>} : memref<2x32xf32, #tpu.memory_space<vmem>>, vector<2x32xf32>,
    return
  }
}

</mosaic_0001>

<bundles_post_ra>
// kernel: tpu_custom_call.1
= control target key start
LH: loop header
LB: loop body
LE: loop exit
PB: predicated region body
PF: predicated region fallthrough
CT: control target
= control target key end

     0   :  { %11 = vsyncpa [#allocation3], 0  ;;  %s1994_s0 = inlined_call_operand.hbm [shape: f32[2,8,16], index: 0, kind: input, shape index: {}]   ;;  %s1995_s1 = inlined_call_operand.hbm [shape: f32[16,128], index: 1, kind: input, shape index: {}]   ;;  %s1996_s2 = inlined_call_operand.hbm [shape: f32[32,128], index: 2, kind: input, shape index: {}]   ;;  %s1997_s3 = inlined_call_operand.vmem [shape: f32[1,128], index: 3, kind: input, shape index: {}]   ;;  %s1998_s4 = inlined_call_operand.hbm [shape: f32[32,32], index: 4, kind: input, shape index: {}]   ;;  %s1999_s5 = inlined_call_operand.vmem [shape: f32[1,32], index: 5, kind: input, shape index: {}]   ;;  %s2000_s6 = inlined_call_operand.hbm [shape: f32[2,32], index: 6, kind: output, shape index: {}]  }
   0x1   :  { %12 = vsyncpa [#allocation6], 0 }
   0x2   :  { %13 = vsyncpa [#allocation9], 0 }
   0x3   :  { %14 = vsyncpa [#allocation4], 0  ;;  %s1684_s21 = smov [#allocation5]   ;;  %s1685_s23 = smov [#allocation2]  }
   0x4   :  { %s32_s22 = sshll.u32 %s1684_s21, 4  ;;  %s20_s24 = sshll.u32 %s1685_s23, 4  ;;  %s33_s22 = int_to_ptr.vmem [resolvable:$true] %s32_s22  ;;  %s1731_s24 = int_to_ptr.vmem [resolvable:$true] %s20_s24 }
   0x5   :  { %s1566_s27 = scalar_lea.hbm %s1995_s1, 256 }
   0x6   :  { %p1567_p0 = scmp.ne.s32.totalorder %s1995_s1, %s1566_s27  ;;  %p1570_p1 = scmp.lt.u32.totalorder %s1566_s27, %s1995_s1 }
   0x8   :  { %p1572_p2 = pnand %p1570_p1, %p1567_p0 }
   0xa   :  { %1575 = shalt.err (!%p1572_p2)
}
   0xb   :  { %s1576_s8 = scalar_lea.vmem %s33_s22, 256  ;;  %p1581_p4 = scmp.lt.s32.totalorder %s33_s22, %s33_s22 }
   0xc   :  { %p1577_p3 = scmp.ne.s32.totalorder %s33_s22, %s1576_s8  ;;  %p1582_p5 = scmp.lt.s32.totalorder %s1576_s8, %s1576_s8 }
   0xe   :  { %p1583_p6 = por %p1582_p5, %p1581_p4 }
  0x10   :  { %p1584_p7 = pnand %p1583_p6, %p1577_p3 }
  0x12   :  { %1587 = shalt.err (!%p1584_p7)
}
  0x13   :  { %s1686_s9 = smov 128   ;;  %s1687_s10 = smov 8  }
  0x14   :  { %38 = dma.hbm_to_vmem [thread:$0]  %s1995_s1, 256, %s33_s22, [#allocation6], %s1686_s9, %s1686_s9, %s1687_s10  }
  0x15   :  { %s1588_s15 = scalar_lea.hbm %s1994_s0, 256 }
  0x16   :  { %p1589_p8 = scmp.ne.s32.totalorder %s1994_s0, %s1588_s15  ;;  %p1592_p9 = scmp.lt.u32.totalorder %s1588_s15, %s1994_s0 }
  0x18   :  { %p1594_p10 = pnand %p1592_p9, %p1589_p8 }
  0x1a   :  { %1597 = shalt.err (!%p1594_p10)
}
  0x1b   :  { %s1598_s20 = scalar_lea.vmem %s1731_s24, 256  ;;  %p1603_p12 = scmp.lt.s32.totalorder %s1731_s24, %s1731_s24 }
  0x1c   :  { %p1599_p11 = scmp.ne.s32.totalorder %s1731_s24, %s1598_s20  ;;  %p1604_p13 = scmp.lt.s32.totalorder %s1598_s20, %s1598_s20 }
  0x1e   :  { %p1605_p0 = por %p1604_p13, %p1603_p12 }
  0x20   :  { %p1606_p1 = pnand %p1605_p0, %p1599_p11 }
  0x22   :  { %1609 = shalt.err (!%p1606_p1)
}
  0x23   :  { %26 = dma.hbm_to_vmem [thread:$0]  %s1994_s0, 256, %s1731_s24, [#allocation3], %s1686_s9, %s1686_s9, %s1687_s10  }
  0x24   :  { %s1688_s22 = smov [#allocation7]   ;;  %s1689_s25 = smov [#allocation8]  }
  0x25   :  { %s44_s23 = sshll.u32 %s1688_s22, 4  ;;  %s58_s26 = sshll.u32 %s1689_s25, 4  ;;  %s45_s23 = int_to_ptr.vmem [resolvable:$true] %s44_s23  ;;  %s1768_s26 = int_to_ptr.vmem [resolvable:$true] %s58_s26 }
  0x26   :  { %s1610_s29 = scalar_lea.hbm %s1996_s2, 512 }
  0x27   :  { %p1611_p2 = scmp.ne.s32.totalorder %s1996_s2, %s1610_s29  ;;  %p1614_p3 = scmp.lt.u32.totalorder %s1610_s29, %s1996_s2 }
  0x29   :  { %p1616_p4 = pnand %p1614_p3, %p1611_p2 }
  0x2b   :  { %1619 = shalt.err (!%p1616_p4)
}
  0x2c   :  { %s1620_s0 = scalar_lea.vmem %s45_s23, 512  ;;  %p1625_p6 = scmp.lt.s32.totalorder %s45_s23, %s45_s23 }
  0x2d   :  { %p1621_p5 = scmp.ne.s32.totalorder %s45_s23, %s1620_s0  ;;  %p1626_p7 = scmp.lt.s32.totalorder %s1620_s0, %s1620_s0 }
  0x2f   :  { %p1627_p8 = por %p1626_p7, %p1625_p6 }
  0x31   :  { %p1628_p9 = pnand %p1627_p8, %p1621_p5 }
  0x33   :  { %1631 = shalt.err (!%p1628_p9)
}
  0x34   :  { %50 = dma.hbm_to_vmem [thread:$0]  %s1996_s2, 512, %s45_s23, [#allocation6], %s1686_s9, %s1686_s9, %s1687_s10  }
  0x35   :  { %s1632_s15 = scalar_lea.hbm %s1998_s4, 512 }
  0x36   :  { %p1633_p10 = scmp.ne.s32.totalorder %s1998_s4, %s1632_s15  ;;  %p1636_p11 = scmp.lt.u32.totalorder %s1632_s15, %s1998_s4 }
  0x38   :  { %p1638_p12 = pnand %p1636_p11, %p1633_p10 }
  0x3a   :  { %1641 = shalt.err (!%p1638_p12)
}
  0x3b   :  { %s1642_s20 = scalar_lea.vmem %s1768_s26, 512  ;;  %p1647_p0 = scmp.lt.s32.totalorder %s1768_s26, %s1768_s26 }
  0x3c   :  { %p1643_p13 = scmp.ne.s32.totalorder %s1768_s26, %s1642_s20  ;;  %p1648_p1 = scmp.lt.s32.totalorder %s1642_s20, %s1642_s20 }
  0x3e   :  { %p1649_p2 = por %p1648_p1, %p1647_p0 }
  0x40   :  { %p1650_p3 = pnand %p1649_p2, %p1643_p13 }
  0x42   :  { %1653 = shalt.err (!%p1650_p3)
}
  0x43   :  { %64 = dma.hbm_to_vmem [thread:$0]  %s1998_s4, 512, %s1768_s26, [#allocation9], %s1686_s9, %s1686_s9, %s1687_s10  }
  0x44   :  { %1676 = dma.done.wait [#allocation3], 256  }
  0x45   :  { %1677 = vsyncadd [#allocation3], 4294967040 }
  0x46   :  { %1678 = dma.done.wait [#allocation6], 768  }
  0x47   :  { %1679 = vsyncadd [#allocation6], 4294966528 }
  0x48   :  { %1680 = dma.done.wait [#allocation9], 512  }
  0x49   :  { %1681 = vsyncadd [#allocation9], 4294966784  ;;  %v1690_v0 = vmov 0.0|0.0   ;;  %vm1691_vm0 = vmmov 0   ;;  %v1692_v1 = vmov 0.0   ;;  %vm90_vm1 = vcmask 130048  }
  0x4a   :  { %1452 = vmatprep.subr.bf16.mxu1 %v1690_v0  ;;  %1357 = vmatprep.mubr.msk.f32.mxu1 %vm1691_vm0, %v1692_v1  ;;  %v81_v2 = vld [vmem:[#allocation5] sm:$0xff]  ;;  %v82_v3 = vld [vmem:[#allocation5 + $0x8] sm:$0xff]  ;;  %v177_v4 = vld [vmem:[#allocation7] sm:$0xff]  ;;  %v172_v15 = vlaneseq  ;;  %vm266_vm4 = vcmask 1041409   ;;  %s1694_s10 = smov 32   ;;  %vm181_vm6 = vcmask 261120  }
  0x4b   :  { %v1448_v5 = vpack.c.bf16 %v82_v3, %v81_v2  ;;  %v178_v6 = vld [vmem:[#allocation7 + $0x8] sm:$0xff]  ;;  %v79_v7 = vld [vmem:[#allocation2] sm:$0xff]  ;;  %v179_v9 = vld [vmem:[#allocation7 + $0x10] sm:$0xff]  ;;  %s1695_s23 = smov [#allocation10]   ;;  %vm1246_vm7 = vcmask 254976  }
  0x4c   :  { %v1808_v8 = vpack.c.bf16 %v178_v6, %v177_v4  ;;  %1346 = vmatprep.mubr.msk.f32.mxu0 %vm90_vm1, %v79_v7  ;;  %v180_v10 = vld [vmem:[#allocation7 + $0x18] sm:$0xff]  ;;  %v80_v11 = vld [vmem:[#allocation2 + $0x8] sm:$0xff]  ;;  %v1265_v14 = vld [vmem:[%s1997_s3] ss:$0 sm:$0xff]  ;;  %v173_v19 = vand.u32 127, %v172_v15  ;;  %s1693_s3 = smov 64  }
  0x4d   :  { %1449 = vmatprep.subr.bf16.mxu0 %v1448_v5  ;;  %v1812_v12 = vpack.c.bf16 %v180_v10, %v179_v9  ;;  %s1254_s25 = sshll.u32 %s1695_s23, 4  ;;  %s1255_s25 = int_to_ptr.vmem [resolvable:$true] %s1254_s25 }
  0x4e   :  { %1454 = vmatpush3.bf16.msra.mxu1 %v1808_v8  ;;  %1451 = vmatpush3.bf16.msra.mxu0 %v1448_v5  ;;  %vm174_vm2 = vcmp.ge.s32.totalorder %v173_v19, 64  ;;  %vm175_vm3 = vcmp.lt.s32.totalorder %v173_v19, 96  ;;  %s1654_s26 = scalar_lea.vmem %s1255_s25, 32  ;;  %p1659_p5 = scmp.lt.s32.totalorder %s1255_s25, %s1255_s25 }
  0x4f   :  { %1455 = vmatprep.subr.bf16.mxu1 %v1690_v0  ;;  %1458 = vmatprep.subr.bf16.mxu0 %v1690_v0  ;;  %vm1841_vm5 = vmand %vm174_vm2, %vm175_vm3  ;;  %p1655_p4 = scmp.ne.s32.totalorder %s1255_s25, %s1654_s26  ;;  %p1660_p6 = scmp.lt.s32.totalorder %s1654_s26, %s1654_s26 }
  0x51   :  { %1347 = vmatmul.mubr.msk.f32.vlgmr.msra.gmra.mrb[0].mxu0 %vm90_vm1, %v80_v11  ;;  %p1661_p7 = por %p1660_p6, %p1659_p5 }
  0x52   :  { %1457 = vmatpush3.bf16.msra.mxu1 %v1812_v12  ;;  %1460 = vmatpush3.bf16.msra.mxu0 %v1808_v8 }
  0x53   :  { %1461 = vmatprep.subr.bf16.mxu0 %v1690_v0  ;;  %1368 = vmatprep.mubr.msk.f32.mxu0 %vm1691_vm0, %v1692_v1  ;;  %p1662_p8 = pnand %p1661_p7, %p1655_p4 }
  0x54   :  { %1464 = vmatprep.subr.bf16.mxu1 %v1690_v0 }
  0x55   :  { %1358 = vmatmul.mubr.f32.vlgmr.msra.gmra.mrb[0].mxu1 %v1692_v1 }
  0x56   :  { %1463 = vmatpush3.bf16.msra.mxu0 %v1812_v12  ;;  %1466 = vmatpush3.bf16.msra.mxu1 %v1808_v8 }
  0x57   :  { %1467 = vmatprep.subr.bf16.mxu1 %v1690_v0  ;;  %1379 = vmatprep.mubr.msk.f32.mxu1 %vm1691_vm0, %v1692_v1 }
  0x58   :  { %1470 = vmatprep.subr.bf16.mxu0 %v1690_v0 }
  0x5a   :  { %1469 = vmatpush3.bf16.msra.mxu1 %v1812_v12 }
  0x5b   :  { %1476 = vmatprep.subr.bf16.mxu1 %v1690_v0 }
 0x124   :  { %v1348_v13 = vpop.f32.mrb[0].mxu0 }
 0x125   :  { %v163_v16 = vpop.f32.mrb[1].mxu0  ;;  %v1835_v17 = vadd.f32 %v1348_v13, %v1265_v14 }
 0x126   :  { %v1837_v18 = vadd.f32 %v1265_v14, %v163_v16 }
 0x128   :  { %v251_v20 = vpop.f32.mrb[0].mxu1 }
 0x129   :  { %v256_v21 = vrot.slane %v251_v20, 1  ;;  %v1359_v22 = vpop.f32.mrb[1].mxu1  ;;  %v259_v23 = vadd.f32 %v251_v20, %v1837_v18 }
 0x12b   :  { %v260_v24 = vadd.f32 %v256_v21, %v1835_v17  ;;  %v261_v28 = vmul.f32 2.0, %v259_v23 }
 0x12d   :  { %v262_v25 = vmul.f32 2.0, %v260_v24  ;;  %v271_v26 = vrot.slane %v260_v24, 7 }
 0x12f   :  { %v265_v29 = vrot.slane %v262_v25, 7  ;;  %v272_v31 = vsel %vm266_vm4, %v271_v26, %v259_v23 }
 0x131   :  { %v267_v30 = vsel %vm266_vm4, %v265_v29, %v261_v28 }
 0x132   :  { %v274_v32 = vsel %vm1841_vm5, %v267_v30, %v272_v31 }
 0x133   :  { %v1268_v33 = vmul.f32 -1.442695, %v274_v32 }
 0x135   :  { %1518 = vpow2.f32 %v1268_v33 }
 0x13f   :  { %v1519_v34 = vpop.eup %1518 }
 0x140   :  { %v278_v35 = vadd.f32 1.0, %v1519_v34 }
 0x142   :  { %1520 = vrcp.f32 %v278_v35 }
 0x14c   :  { %v1521_v36 = vpop.eup %1520 }
 0x14d   :  { %v281_v37 = vmul.f32 2.0, %v1521_v36 }
 0x14f   :  { %v1269_v38 = vadd.f32 -1.0, %v281_v37 }
 0x151   :  { %v283_v39 = vsel %vm1841_vm5, %v1269_v38, %v1521_v36 }
 0x152   :  { %286 = vrot.lane.b32.xlu0 %v283_v39, %s1693_s3  ;;  %v284_v42 = vmul.f32 0.0, %v283_v39 }
 0x1c4   :  { %v287_v40 = vpop.permute.xlu0 %286 }
 0x1c5   :  { %v289_v41 = vmul.f32 %v287_v40, %v283_v39 }
 0x1c7   :  { %291 = vrot.lane.b32.xlu0 %v289_v41, %s1694_s10 }
 0x239   :  { %v292_v43 = vpop.permute.xlu0 %291 }
 0x23a   :  { %v294_v44 = vadd.f32 %v292_v43, %v284_v42 }
 0x23c   :  { %1522 = vtanh.f32 %v294_v44 }
 0x246   :  { %v1523_v45 = vpop.eup %1522 }
 0x247   :  { %297 = vrot.lane.b32.xlu1 %v1523_v45, %s1693_s3 }
 0x2b9   :  { %v298_v46 = vpop.permute.xlu1 %297 }
 0x2ba   :  { %v300_v47 = vmul.f32 %v298_v46, %v283_v39 }
 0x2bc   :  { %302 = vrot.lane.b32.xlu1 %v300_v47, %s1694_s10 }
 0x32e   :  { %v303_v48 = vpop.permute.xlu1 %302 }
 0x32f   :  { %1369 = vmatmul.mubr.msk.f32.vlgmr.msra.gmra.mrb[2].mxu0 %vm181_vm6, %v303_v48 }
 0x330   :  { %1472 = vmatpush3.bf16.msra.mxu0 %v1808_v8  ;;  %1390 = vmatprep.mubr.msk.f32.mxu0 %vm1691_vm0, %v1692_v1 }
 0x331   :  { %1473 = vmatprep.subr.bf16.mxu0 %v1690_v0 }
 0x334   :  { %1475 = vmatpush3.bf16.msra.mxu0 %v1812_v12 }
 0x335   :  { %1482 = vmatprep.subr.bf16.mxu0 %v1690_v0 }
 0x402   :  { %v372_v49 = vpop.f32.mrb[2].mxu0 }
 0x403   :  { %v377_v50 = vrot.slane %v372_v49, 7  ;;  %v1370_v51 = vpop.f32.mrb[3].mxu0  ;;  %v381_v53 = vadd.f32 %v372_v49, %v1835_v17 }
 0x405   :  { %v380_v52 = vadd.f32 %v377_v50, %v1837_v18  ;;  %v383_v56 = vmul.f32 2.0, %v381_v53 }
 0x407   :  { %v382_v54 = vmul.f32 2.0, %v380_v52  ;;  %v391_v55 = vrot.slane %v380_v52, 1 }
 0x409   :  { %v386_v57 = vrot.slane %v382_v54, 1  ;;  %v392_v59 = vsel %vm266_vm4, %v381_v53, %v391_v55 }
 0x40b   :  { %v387_v58 = vsel %vm266_vm4, %v383_v56, %v386_v57 }
 0x40c   :  { %v394_v60 = vsel %vm1841_vm5, %v387_v58, %v392_v59 }
 0x40d   :  { %v1271_v61 = vmul.f32 -1.442695, %v394_v60 }
 0x40f   :  { %1524 = vpow2.f32 %v1271_v61 }
 0x419   :  { %v1525_v62 = vpop.eup %1524 }
 0x41a   :  { %v398_v63 = vadd.f32 1.0, %v1525_v62 }
 0x41c   :  { %1526 = vrcp.f32 %v398_v63 }
 0x426   :  { %v1527_v2 = vpop.eup %1526 }
 0x427   :  { %v401_v3 = vmul.f32 2.0, %v1527_v2 }
 0x429   :  { %v1272_v4 = vadd.f32 -1.0, %v401_v3 }
 0x42b   :  { %v403_v5 = vsel %vm1841_vm5, %v1272_v4, %v1527_v2 }
 0x42c   :  { %406 = vrot.lane.b32.xlu0 %v403_v5, %s1693_s3  ;;  %v404_v9 = vmul.f32 %v403_v5, %v294_v44 }
 0x49e   :  { %v407_v6 = vpop.permute.xlu0 %406 }
 0x49f   :  { %v409_v7 = vmul.f32 %v407_v6, %v403_v5 }
 0x4a1   :  { %411 = vrot.lane.b32.xlu1 %v409_v7, %s1694_s10 }
 0x513   :  { %v412_v10 = vpop.permute.xlu1 %411 }
 0x514   :  { %v414_v11 = vadd.f32 %v412_v10, %v404_v9 }
 0x516   :  { %1528 = vtanh.f32 %v414_v11 }
 0x520   :  { %v1529_v13 = vpop.eup %1528 }
 0x521   :  { %417 = vrot.lane.b32.xlu0 %v1529_v13, %s1693_s3 }
 0x593   :  { %v418_v14 = vpop.permute.xlu0 %417 }
 0x594   :  { %v420_v15 = vmul.f32 %v418_v14, %v403_v5 }
 0x596   :  { %422 = vrot.lane.b32.xlu1 %v420_v15, %s1694_s10 }
 0x608   :  { %v423_v16 = vpop.permute.xlu1 %422 }
 0x609   :  { %1380 = vmatmul.mubr.msk.f32.vlgmr.msra.gmra.mrb[2].mxu1 %vm181_vm6, %v423_v16 }
 0x60a   :  { %1478 = vmatpush3.bf16.msra.mxu1 %v1808_v8  ;;  %1401 = vmatprep.mubr.msk.f32.mxu1 %vm1691_vm0, %v1692_v1 }
 0x60b   :  { %1479 = vmatprep.subr.bf16.mxu1 %v1690_v0 }
 0x60e   :  { %1481 = vmatpush3.bf16.msra.mxu1 %v1812_v12 }
 0x60f   :  { %1488 = vmatprep.subr.bf16.mxu1 %v1690_v0 }
 0x6dc   :  { %v492_v19 = vpop.f32.mrb[2].mxu1 }
 0x6dd   :  { %v497_v20 = vrot.slane %v492_v19, 6  ;;  %v498_v21 = vrot.slane %v492_v19, 7  ;;  %v1381_v22 = vpop.f32.mrb[3].mxu1 }
 0x6df   :  { %v501_v23 = vadd.f32 %v497_v20, %v1837_v18  ;;  %v502_v24 = vadd.f32 %v498_v21, %v1835_v17 }
 0x6e1   :  { %v503_v25 = vmul.f32 2.0, %v501_v23  ;;  %v504_v26 = vmul.f32 2.0, %v502_v24  ;;  %v513_v28 = vrot.slane %v501_v23, 2  ;;  %v514_v29 = vrot.slane %v502_v24, 1 }
 0x6e3   :  { %v507_v30 = vrot.slane %v503_v25, 2  ;;  %v508_v31 = vrot.slane %v504_v26, 1  ;;  %v515_v33 = vsel %vm266_vm4, %v514_v29, %v513_v28 }
 0x6e5   :  { %v509_v32 = vsel %vm266_vm4, %v508_v31, %v507_v30 }
 0x6e6   :  { %v517_v34 = vsel %vm1841_vm5, %v509_v32, %v515_v33 }
 0x6e7   :  { %v1274_v35 = vmul.f32 -1.442695, %v517_v34 }
 0x6e9   :  { %1530 = vpow2.f32 %v1274_v35 }
 0x6f3   :  { %v1531_v36 = vpop.eup %1530 }
 0x6f4   :  { %v521_v37 = vadd.f32 1.0, %v1531_v36 }
 0x6f6   :  { %1532 = vrcp.f32 %v521_v37 }
 0x700   :  { %v1533_v38 = vpop.eup %1532 }
 0x701   :  { %v524_v39 = vmul.f32 2.0, %v1533_v38 }
 0x703   :  { %v1275_v40 = vadd.f32 -1.0, %v524_v39 }
 0x705   :  { %v526_v41 = vsel %vm1841_vm5, %v1275_v40, %v1533_v38 }
 0x706   :  { %529 = vrot.lane.b32.xlu0 %v526_v41, %s1693_s3  ;;  %v527_v44 = vmul.f32 %v526_v41, %v414_v11 }
 0x778   :  { %v530_v42 = vpop.permute.xlu0 %529 }
 0x779   :  { %v532_v43 = vmul.f32 %v530_v42, %v526_v41 }
 0x77b   :  { %534 = vrot.lane.b32.xlu1 %v532_v43, %s1694_s10 }
 0x7ed   :  { %v535_v45 = vpop.permute.xlu1 %534 }
 0x7ee   :  { %v537_v46 = vadd.f32 %v535_v45, %v527_v44 }
 0x7f0   :  { %1534 = vtanh.f32 %v537_v46 }
 0x7fa   :  { %v1535_v47 = vpop.eup %1534 }
 0x7fb   :  { %540 = vrot.lane.b32.xlu0 %v1535_v47, %s1693_s3 }
 0x86d   :  { %v541_v48 = vpop.permute.xlu0 %540 }
 0x86e   :  { %v543_v49 = vmul.f32 %v541_v48, %v526_v41 }
 0x870   :  { %545 = vrot.lane.b32.xlu1 %v543_v49, %s1694_s10 }
 0x8e2   :  { %v546_v50 = vpop.permute.xlu1 %545 }
 0x8e3   :  { %1391 = vmatmul.mubr.msk.f32.vlgmr.msra.gmra.mrb[4].mxu0 %vm181_vm6, %v546_v50 }
 0x8e4   :  { %1484 = vmatpush3.bf16.msra.mxu0 %v1808_v8  ;;  %1412 = vmatprep.mubr.msk.f32.mxu0 %vm1691_vm0, %v1692_v1 }
 0x8e5   :  { %1485 = vmatprep.subr.bf16.mxu0 %v1690_v0 }
 0x8e8   :  { %1487 = vmatpush3.bf16.msra.mxu0 %v1812_v12 }
 0x8e9   :  { %1494 = vmatprep.subr.bf16.mxu0 %v1690_v0 }
 0x9b6   :  { %v615_v51 = vpop.f32.mrb[4].mxu0 }
 0x9b7   :  { %v620_v52 = vrot.slane %v615_v51, 5  ;;  %v621_v53 = vrot.slane %v615_v51, 6  ;;  %v1392_v54 = vpop.f32.mrb[5].mxu0 }
 0x9b9   :  { %v624_v55 = vadd.f32 %v620_v52, %v1837_v18  ;;  %v625_v56 = vadd.f32 %v621_v53, %v1835_v17 }
 0x9bb   :  { %v626_v57 = vmul.f32 2.0, %v624_v55  ;;  %v627_v58 = vmul.f32 2.0, %v625_v56  ;;  %v636_v59 = vrot.slane %v624_v55, 3  ;;  %v637_v60 = vrot.slane %v625_v56, 2 }
 0x9bd   :  { %v630_v61 = vrot.slane %v626_v57, 3  ;;  %v631_v62 = vrot.slane %v627_v58, 2  ;;  %v638_v2 = vsel %vm266_vm4, %v637_v60, %v636_v59 }
 0x9bf   :  { %v632_v63 = vsel %vm266_vm4, %v631_v62, %v630_v61 }
 0x9c0   :  { %v640_v3 = vsel %vm1841_vm5, %v632_v63, %v638_v2 }
 0x9c1   :  { %v1277_v4 = vmul.f32 -1.442695, %v640_v3 }
 0x9c3   :  { %1536 = vpow2.f32 %v1277_v4 }
 0x9cd   :  { %v1537_v5 = vpop.eup %1536 }
 0x9ce   :  { %v644_v6 = vadd.f32 1.0, %v1537_v5 }
 0x9d0   :  { %1538 = vrcp.f32 %v644_v6 }
 0x9da   :  { %v1539_v7 = vpop.eup %1538 }
 0x9db   :  { %v647_v9 = vmul.f32 2.0, %v1539_v7 }
 0x9dd   :  { %v1278_v10 = vadd.f32 -1.0, %v647_v9 }
 0x9df   :  { %v649_v11 = vsel %vm1841_vm5, %v1278_v10, %v1539_v7 }
 0x9e0   :  { %652 = vrot.lane.b32.xlu0 %v649_v11, %s1693_s3  ;;  %v650_v15 = vmul.f32 %v649_v11, %v537_v46 }
 0xa52   :  { %v653_v13 = vpop.permute.xlu0 %652 }
 0xa53   :  { %v655_v14 = vmul.f32 %v653_v13, %v649_v11 }
 0xa55   :  { %657 = vrot.lane.b32.xlu1 %v655_v14, %s1694_s10 }
 0xac7   :  { %v658_v16 = vpop.permute.xlu1 %657 }
 0xac8   :  { %v660_v19 = vadd.f32 %v658_v16, %v650_v15 }
 0xaca   :  { %1540 = vtanh.f32 %v660_v19 }
 0xad4   :  { %v1541_v20 = vpop.eup %1540 }
 0xad5   :  { %663 = vrot.lane.b32.xlu0 %v1541_v20, %s1693_s3 }
 0xb47   :  { %v664_v21 = vpop.permute.xlu0 %663 }
 0xb48   :  { %v666_v22 = vmul.f32 %v664_v21, %v649_v11 }
 0xb4a   :  { %668 = vrot.lane.b32.xlu1 %v666_v22, %s1694_s10 }
 0xbbc   :  { %v669_v23 = vpop.permute.xlu1 %668 }
 0xbbd   :  { %1402 = vmatmul.mubr.msk.f32.vlgmr.msra.gmra.mrb[4].mxu1 %vm181_vm6, %v669_v23 }
 0xbbe   :  { %1490 = vmatpush3.bf16.msra.mxu1 %v1808_v8  ;;  %1423 = vmatprep.mubr.msk.f32.mxu1 %vm1691_vm0, %v1692_v1 }
 0xbbf   :  { %1491 = vmatprep.subr.bf16.mxu1 %v1690_v0 }
 0xbc2   :  { %1493 = vmatpush3.bf16.msra.mxu1 %v1812_v12 }
 0xbc3   :  { %1500 = vmatprep.subr.bf16.mxu1 %v1690_v0 }
 0xc90   :  { %v738_v24 = vpop.f32.mrb[4].mxu1 }
 0xc91   :  { %v743_v25 = vrot.slane %v738_v24, 4  ;;  %v744_v26 = vrot.slane %v738_v24, 5  ;;  %v1403_v28 = vpop.f32.mrb[5].mxu1 }
 0xc93   :  { %v747_v29 = vadd.f32 %v743_v25, %v1837_v18  ;;  %v748_v30 = vadd.f32 %v744_v26, %v1835_v17 }
 0xc95   :  { %v749_v31 = vmul.f32 2.0, %v747_v29  ;;  %v750_v32 = vmul.f32 2.0, %v748_v30  ;;  %v759_v33 = vrot.slane %v747_v29, 4  ;;  %v760_v34 = vrot.slane %v748_v30, 3 }
 0xc97   :  { %v753_v35 = vrot.slane %v749_v31, 4  ;;  %v754_v36 = vrot.slane %v750_v32, 3  ;;  %v761_v38 = vsel %vm266_vm4, %v760_v34, %v759_v33 }
 0xc99   :  { %v755_v37 = vsel %vm266_vm4, %v754_v36, %v753_v35 }
 0xc9a   :  { %v763_v39 = vsel %vm1841_vm5, %v755_v37, %v761_v38 }
 0xc9b   :  { %v1280_v40 = vmul.f32 -1.442695, %v763_v39 }
 0xc9d   :  { %1542 = vpow2.f32 %v1280_v40 }
 0xca7   :  { %v1543_v41 = vpop.eup %1542 }
 0xca8   :  { %v767_v42 = vadd.f32 1.0, %v1543_v41 }
 0xcaa   :  { %1544 = vrcp.f32 %v767_v42 }
 0xcb4   :  { %v1545_v43 = vpop.eup %1544 }
 0xcb5   :  { %v770_v44 = vmul.f32 2.0, %v1545_v43 }
 0xcb7   :  { %v1281_v45 = vadd.f32 -1.0, %v770_v44 }
 0xcb9   :  { %v772_v46 = vsel %vm1841_vm5, %v1281_v45, %v1545_v43 }
 0xcba   :  { %775 = vrot.lane.b32.xlu0 %v772_v46, %s1693_s3  ;;  %v773_v49 = vmul.f32 %v772_v46, %v660_v19 }
 0xd2c   :  { %v776_v47 = vpop.permute.xlu0 %775 }
 0xd2d   :  { %v778_v48 = vmul.f32 %v776_v47, %v772_v46 }
 0xd2f   :  { %780 = vrot.lane.b32.xlu1 %v778_v48, %s1694_s10 }
 0xda1   :  { %v781_v50 = vpop.permute.xlu1 %780 }
 0xda2   :  { %v783_v51 = vadd.f32 %v781_v50, %v773_v49 }
 0xda4   :  { %1546 = vtanh.f32 %v783_v51 }
 0xdae   :  { %v1547_v52 = vpop.eup %1546 }
 0xdaf   :  { %786 = vrot.lane.b32.xlu0 %v1547_v52, %s1693_s3 }
 0xe21   :  { %v787_v53 = vpop.permute.xlu0 %786 }
 0xe22   :  { %v789_v54 = vmul.f32 %v787_v53, %v772_v46 }
 0xe24   :  { %791 = vrot.lane.b32.xlu1 %v789_v54, %s1694_s10 }
 0xe96   :  { %v792_v55 = vpop.permute.xlu1 %791 }
 0xe97   :  { %1413 = vmatmul.mubr.msk.f32.vlgmr.msra.gmra.mrb[6].mxu0 %vm181_vm6, %v792_v55 }
 0xe98   :  { %1496 = vmatpush3.bf16.msra.mxu0 %v1808_v8  ;;  %1434 = vmatprep.mubr.msk.f32.mxu0 %vm1691_vm0, %v1692_v1 }
 0xe99   :  { %1497 = vmatprep.subr.bf16.mxu0 %v1690_v0 }
 0xe9c   :  { %1499 = vmatpush3.bf16.msra.mxu0 %v1812_v12 }
 0xf6a   :  { %v861_v56 = vpop.f32.mrb[6].mxu0 }
 0xf6b   :  { %v866_v57 = vrot.slane %v861_v56, 3  ;;  %v867_v58 = vrot.slane %v861_v56, 4  ;;  %v1414_v59 = vpop.f32.mrb[7].mxu0 }
 0xf6d   :  { %v870_v60 = vadd.f32 %v866_v57, %v1837_v18  ;;  %v871_v61 = vadd.f32 %v867_v58, %v1835_v17 }
 0xf6f   :  { %v872_v62 = vmul.f32 2.0, %v870_v60  ;;  %v873_v63 = vmul.f32 2.0, %v871_v61  ;;  %v882_v2 = vrot.slane %v870_v60, 5  ;;  %v883_v3 = vrot.slane %v871_v61, 4 }
 0xf71   :  { %v876_v8 = vrot.slane %v872_v62, 5  ;;  %v877_v4 = vrot.slane %v873_v63, 4  ;;  %v884_v6 = vsel %vm266_vm4, %v883_v3, %v882_v2 }
 0xf73   :  { %v878_v5 = vsel %vm266_vm4, %v877_v4, %v876_v8 }
 0xf74   :  { %v886_v12 = vsel %vm1841_vm5, %v878_v5, %v884_v6 }
 0xf75   :  { %v1283_v7 = vmul.f32 -1.442695, %v886_v12 }
 0xf77   :  { %1548 = vpow2.f32 %v1283_v7 }
 0xf81   :  { %v1549_v9 = vpop.eup %1548 }
 0xf82   :  { %v890_v10 = vadd.f32 1.0, %v1549_v9 }
 0xf84   :  { %1550 = vrcp.f32 %v890_v10 }
 0xf8e   :  { %v1551_v11 = vpop.eup %1550 }
 0xf8f   :  { %v893_v13 = vmul.f32 2.0, %v1551_v11 }
 0xf91   :  { %v1284_v14 = vadd.f32 -1.0, %v893_v13 }
 0xf93   :  { %v895_v15 = vsel %vm1841_vm5, %v1284_v14, %v1551_v11 }
 0xf94   :  { %898 = vrot.lane.b32.xlu0 %v895_v15, %s1693_s3  ;;  %v896_v20 = vmul.f32 %v895_v15, %v783_v51 }
0x1006   :  { %v899_v16 = vpop.permute.xlu0 %898 }
0x1007   :  { %v901_v19 = vmul.f32 %v899_v16, %v895_v15 }
0x1009   :  { %903 = vrot.lane.b32.xlu1 %v901_v19, %s1694_s10 }
0x107b   :  { %v904_v21 = vpop.permute.xlu1 %903 }
0x107c   :  { %v906_v22 = vadd.f32 %v904_v21, %v896_v20 }
0x107e   :  { %1552 = vtanh.f32 %v906_v22 }
0x1088   :  { %v1553_v23 = vpop.eup %1552 }
0x1089   :  { %909 = vrot.lane.b32.xlu0 %v1553_v23, %s1693_s3  ;;  %v1159_v23 = vld [vmem:[#allocation8] sm:$0xff] }
0x10fb   :  { %v910_v24 = vpop.permute.xlu0 %909 }
0x10fc   :  { %v912_v25 = vmul.f32 %v910_v24, %v895_v15  ;;  %v1160_v24 = vld [vmem:[#allocation8 + $0x8] sm:$0xff] }
0x10fe   :  { %914 = vrot.lane.b32.xlu1 %v912_v25, %s1694_s10  ;;  %v1161_v25 = vld [vmem:[#allocation8 + $0x10] sm:$0xff] }
0x1170   :  { %v915_v26 = vpop.permute.xlu1 %914 }
0x1171   :  { %1424 = vmatmul.mubr.msk.f32.vlgmr.msra.gmra.mrb[6].mxu1 %vm181_vm6, %v915_v26  ;;  %v1501_v26 = vpack.c.bf16 %v1160_v24, %v1159_v23 }
0x1172   :  { %1445 = vmatprep.mubr.msk.f32.mxu1 %vm1691_vm0, %v1692_v1 }
0x1173   :  { %1502 = vmatpush3.bf16.msra.mxu1 %v1501_v26 }
0x1174   :  { %1503 = vmatprep.subr.bf16.mxu1 %v1690_v0 }
0x1244   :  { %v984_v28 = vpop.f32.mrb[6].mxu1 }
0x1245   :  { %v989_v29 = vrot.slane %v984_v28, 2  ;;  %v990_v30 = vrot.slane %v984_v28, 3  ;;  %v1425_v31 = vpop.f32.mrb[7].mxu1  ;;  %v1162_v28 = vld [vmem:[#allocation8 + $0x18] sm:$0xff] }
0x1247   :  { %v993_v32 = vadd.f32 %v989_v29, %v1837_v18  ;;  %v994_v33 = vadd.f32 %v990_v30, %v1835_v17  ;;  %v1504_v29 = vpack.c.bf16 %v1162_v28, %v1161_v25 }
0x1249   :  { %v995_v34 = vmul.f32 2.0, %v993_v32  ;;  %v996_v35 = vmul.f32 2.0, %v994_v33  ;;  %v1005_v36 = vrot.slane %v993_v32, 6  ;;  %v1006_v37 = vrot.slane %v994_v33, 5  ;;  %1505 = vmatpush3.bf16.msra.mxu1 %v1504_v29  ;;  %v1291_v33 = vld [vmem:[%s1999_s5] ss:$0 sm:$0xff] }
0x124b   :  { %v999_v38 = vrot.slane %v995_v34, 6  ;;  %v1000_v39 = vrot.slane %v996_v35, 5  ;;  %v1007_v41 = vsel %vm266_vm4, %v1006_v37, %v1005_v36 }
0x124d   :  { %v1001_v40 = vsel %vm266_vm4, %v1000_v39, %v999_v38 }
0x124e   :  { %v1009_v1 = vsel %vm1841_vm5, %v1001_v40, %v1007_v41 }
0x124f   :  { %v1286_v42 = vmul.f32 -1.442695, %v1009_v1 }
0x1251   :  { %1554 = vpow2.f32 %v1286_v42 }
0x125b   :  { %v1555_v43 = vpop.eup %1554 }
0x125c   :  { %v1013_v44 = vadd.f32 1.0, %v1555_v43 }
0x125e   :  { %1556 = vrcp.f32 %v1013_v44 }
0x1268   :  { %v1557_v45 = vpop.eup %1556 }
0x1269   :  { %v1016_v46 = vmul.f32 2.0, %v1557_v45 }
0x126b   :  { %v1287_v47 = vadd.f32 -1.0, %v1016_v46 }
0x126d   :  { %v1018_v48 = vsel %vm1841_vm5, %v1287_v47, %v1557_v45 }
0x126e   :  { %1021 = vrot.lane.b32.xlu0 %v1018_v48, %s1693_s3  ;;  %v1019_v51 = vmul.f32 %v1018_v48, %v906_v22 }
0x12e0   :  { %v1022_v49 = vpop.permute.xlu0 %1021 }
0x12e1   :  { %v1024_v50 = vmul.f32 %v1022_v49, %v1018_v48 }
0x12e3   :  { %1026 = vrot.lane.b32.xlu1 %v1024_v50, %s1694_s10 }
0x1355   :  { %v1027_v52 = vpop.permute.xlu1 %1026 }
0x1356   :  { %v1029_v53 = vadd.f32 %v1027_v52, %v1019_v51 }
0x1358   :  { %1558 = vtanh.f32 %v1029_v53 }
0x1362   :  { %v1559_v54 = vpop.eup %1558 }
0x1363   :  { %1032 = vrot.lane.b32.xlu0 %v1559_v54, %s1693_s3 }
0x13d5   :  { %v1033_v55 = vpop.permute.xlu0 %1032 }
0x13d6   :  { %v1035_v56 = vmul.f32 %v1033_v55, %v1018_v48 }
0x13d8   :  { %1037 = vrot.lane.b32.xlu1 %v1035_v56, %s1694_s10 }
0x144a   :  { %v1038_v57 = vpop.permute.xlu1 %1037 }
0x144b   :  { %1435 = vmatmul.mubr.msk.f32.vlgmr.msra.gmra.mrb[8].mxu0 %vm181_vm6, %v1038_v57 }
0x151e   :  { %v1107_v58 = vpop.f32.mrb[8].mxu0 }
0x151f   :  { %v1112_v59 = vrot.slane %v1107_v58, 1  ;;  %v1113_v60 = vrot.slane %v1107_v58, 2  ;;  %v1436_v61 = vpop.f32.mrb[9].mxu0 }
0x1521   :  { %v1116_v62 = vadd.f32 %v1112_v59, %v1837_v18  ;;  %v1117_v63 = vadd.f32 %v1113_v60, %v1835_v17 }
0x1523   :  { %v1118_v2 = vmul.f32 2.0, %v1116_v62  ;;  %v1119_v3 = vmul.f32 2.0, %v1117_v63  ;;  %v1128_v8 = vrot.slane %v1116_v62, 7  ;;  %v1129_v4 = vrot.slane %v1117_v63, 6 }
0x1525   :  { %v1122_v5 = vrot.slane %v1118_v2, 7  ;;  %v1123_v6 = vrot.slane %v1119_v3, 6  ;;  %v1130_v7 = vsel %vm266_vm4, %v1129_v4, %v1128_v8 }
0x1527   :  { %v1124_v12 = vsel %vm266_vm4, %v1123_v6, %v1122_v5 }
0x1528   :  { %v1132_v9 = vsel %vm1841_vm5, %v1124_v12, %v1130_v7 }
0x1529   :  { %v1289_v10 = vmul.f32 -1.442695, %v1132_v9 }
0x152b   :  { %1560 = vpow2.f32 %v1289_v10 }
0x1535   :  { %v1561_v11 = vpop.eup %1560 }
0x1536   :  { %v1136_v13 = vadd.f32 1.0, %v1561_v11 }
0x1538   :  { %1562 = vrcp.f32 %v1136_v13 }
0x1542   :  { %v1563_v18 = vpop.eup %1562 }
0x1543   :  { %v1139_v17 = vmul.f32 2.0, %v1563_v18 }
0x1545   :  { %v1290_v14 = vadd.f32 -1.0, %v1139_v17 }
0x1547   :  { %v1141_v15 = vsel %vm1841_vm5, %v1290_v14, %v1563_v18 }
0x1548   :  { %1144 = vrot.lane.b32.xlu0 %v1141_v15, %s1693_s3  ;;  %v1142_v20 = vmul.f32 %v1141_v15, %v1029_v53 }
0x15ba   :  { %v1145_v16 = vpop.permute.xlu0 %1144 }
0x15bb   :  { %v1147_v19 = vmul.f32 %v1145_v16, %v1141_v15 }
0x15bd   :  { %1149 = vrot.lane.b32.xlu1 %v1147_v19, %s1694_s10 }
0x162f   :  { %v1150_v21 = vpop.permute.xlu1 %1149 }
0x1630   :  { %v1152_v22 = vadd.f32 %v1150_v21, %v1142_v20 }
0x1632   :  { %1564 = vtanh.f32 %v1152_v22 }
0x163c   :  { %v1565_v27 = vpop.eup %1564 }
0x163d   :  { %1155 = vrot.lane.b32.xlu0 %v1565_v27, %s1693_s3 }
0x16af   :  { %v1156_v30 = vpop.permute.xlu0 %1155 }
0x16b0   :  { %v1158_v31 = vmul.f32 %v1156_v30, %v1141_v15 }
0x16b2   :  { %1171 = vrot.lane.b32.xlu1 %v1158_v31, %s1694_s10 }
0x1724   :  { %v1172_v32 = vpop.permute.xlu1 %1171 }
0x1725   :  { %1446 = vmatmul.mubr.msk.f32.vlgmr.msra.gmra.mrb[8].mxu1 %vm181_vm6, %v1172_v32 }
0x17f8   :  { %v1241_v34 = vpop.f32.mrb[8].mxu1 }
0x17f9   :  { %v1242_v35 = vadd.f32 %v1291_v33, %v1241_v34  ;;  %v1447_v0 = vpop.f32.mrb[9].mxu1 }
0x17fb   :  { %v1245_v36 = vmax.f32 %v1242_v35, 0.0 }
0x17fd   :  { %1247 = vst.msk [vmem:[#allocation10] sm:$0x3] %vm1246_vm7, %v1245_v36 }
0x17fe   :  { %1665 = shalt.err (!%p1662_p8)
}
0x17ff   :  { %s1666_s5 = scalar_lea.hbm %s2000_s6, 32 }
0x1800   :  { %p1667_p9 = scmp.ne.s32.totalorder %s2000_s6, %s1666_s5  ;;  %p1670_p10 = scmp.lt.u32.totalorder %s1666_s5, %s2000_s6 }
0x1802   :  { %p1672_p11 = pnand %p1670_p10, %p1667_p9 }
0x1804   :  { %1675 = shalt.err (!%p1672_p11)
}
0x1805   :  { %1257 = dma.vmem_to_hbm [thread:$0]  %s1255_s25, 32, %s2000_s6, [#allocation4]  }
0x1806   :  { %1682 = dma.done.wait [#allocation4], 32  }
0x1807   :  { %1683 = vsyncadd [#allocation4], 4294967264 }
0x1808   :  { %1261 = vsyncpa [#allocation3], 1 }
0x1809   :  { %1262 = vsyncpa [#allocation6], 1 }
0x180a   :  { %1263 = vsyncpa [#allocation9], 1 }
0x180b   :  { %1264 = vsyncpa [#allocation4], 1 }

</bundles_post_ra>
